<compile_context>
chip_gen: v7x
topology: tpu7x:2x2x1
jax: 0.10.0
libtpu: 0.0.40
codegen_flags: <defaults>
</compile_context>

<pallas_src>
import functools

import jax
import jax.numpy as jnp
from jax import lax
from jax.experimental import pallas as pl
from jax.experimental.pallas import tpu as pltpu


# ----------------------------------------------------------------------------
# Kernel 1: furthest point sampling, sublane-dense working set.
# ----------------------------------------------------------------------------
def _fps_kernel(xyz_ref, idx_ref, cent_ref, *, num_group, num_valid):
    # xyz_ref : (3, 8, L) f32  (point n lives at sublane n // L, lane n % L)
    # idx_ref : (G, 1) i32     cent_ref: (G, 3) f32
    _, _, L = xyz_ref.shape
    n_total = 8 * L
    # Flat point index of every (sublane, lane) position.
    idx2d = (lax.broadcasted_iota(jnp.int32, (8, L), 0) * L
             + lax.broadcasted_iota(jnp.int32, (8, L), 1))
    # Padded positions start with a negative running distance -> never selected.
    dist0 = jnp.where(idx2d < num_valid, jnp.float32(1e10), jnp.float32(-1.0))
    far0 = jnp.zeros((1, 1), jnp.int32)          # pointnet2 FPS starts at point 0

    def body(i, carry):
        distance, farthest = carry
        idx_ref[pl.ds(i, 1), :] = farthest       # record the i-th selected index
        mask = idx2d == farthest                 # one-hot over the point cloud
        d = jnp.zeros((8, L), jnp.float32)
        cen_parts = []
        for c in range(3):                       # planes re-read from VMEM per iter
            plane = xyz_ref[c]                   # (8, L)
            cen_c = jnp.sum(jnp.where(mask, plane, 0.0), axis=1, keepdims=True)
            cen_c = jnp.sum(cen_c, axis=0, keepdims=True)             # (1, 1)
            cen_parts.append(cen_c)
            diff = plane - cen_c
            d = d + diff * diff
        cent_ref[pl.ds(i, 1), :] = jnp.concatenate(cen_parts, axis=1)  # (1, 3)
        distance = jnp.minimum(distance, d)
        maxv = jnp.max(jnp.max(distance, axis=1, keepdims=True),
                       axis=0, keepdims=True)                          # (1, 1)
        cand = jnp.where(distance == maxv, idx2d, n_total)
        farthest = jnp.min(jnp.min(cand, axis=1, keepdims=True),
                           axis=0, keepdims=True)    # smallest-index tie-break
        return distance, farthest

    lax.fori_loop(0, num_group, body, (dist0, far0))


def furthest_point_sample(xyz_t, num_group):
    """xyz_t: (B, 3, N) f32. Returns fps_idx (B, G) i32 and center (B, G, 3) f32."""
    B, three, N = xyz_t.shape
    assert three == 3
    G = num_group
    n_pad = ((N + 7) // 8) * 8
    if n_pad != N:
        xyz_t = jnp.pad(xyz_t, ((0, 0), (0, 0), (0, n_pad - N)))
    L = n_pad // 8
    xyz_p = xyz_t.reshape(B, 3, 8, L)            # free row-major reshape
    flops = int(B * G * 20 * n_pad)
    bytes_acc = int(B * (3 * n_pad * 4 + G * 4 + 3 * G * 4))
    idx, cent = pl.pallas_call(
        functools.partial(_fps_kernel, num_group=G, num_valid=N),
        out_shape=(jax.ShapeDtypeStruct((B, G, 1), jnp.int32),
                   jax.ShapeDtypeStruct((B, G, 3), jnp.float32)),
        grid=(B,),
        in_specs=[pl.BlockSpec((None, 3, 8, L), lambda b: (b, 0, 0, 0))],
        out_specs=(pl.BlockSpec((None, G, 1), lambda b: (b, 0, 0)),
                   pl.BlockSpec((None, G, 3), lambda b: (b, 0, 0))),
        compiler_params=pltpu.CompilerParams(dimension_semantics=("parallel",)),
        cost_estimate=pl.CostEstimate(flops=flops, transcendentals=0,
                                      bytes_accessed=bytes_acc),
    )(xyz_p)
    return idx.reshape(B, G), cent


# ----------------------------------------------------------------------------
# Kernel 2: fused KNN (exact distances, VPU) + chunked one-hot MXU gather
#           + center-relative features, lane-dense output.
# ----------------------------------------------------------------------------
def _knn_group_kernel(xyzt_ref, x_ref, center_ref, newpts_ref, out_ref,
                      d_ref, oh_ref, *, group_size, chunk):
    # xyzt_ref: (3, N)   x_ref: (N, C)   center_ref: (gb, 3)  newpts_ref: (gb, C)
    # out_ref : (gb, SCp): columns [0, S*C) = (x[knn_k] - x[center]) row-major
    #           over (k, c); columns >= S*C are zero lane padding.
    # d_ref   : (gb, N) f32 scratch (running min-distances)
    # oh_ref  : (chunk, gb, N) scratch (per-chunk one-hot gather weights)
    gb = center_ref.shape[0]
    N, C = x_ref.shape
    S = group_size

    # Exact pairwise squared distances on the VPU (contraction dim is only 3,
    # so the MXU would be ~3/256 utilized) -> written to the VMEM scratch.
    d = jnp.zeros((gb, N), jnp.float32)
    for c in range(3):
        diff = center_ref[:, c:c + 1] - xyzt_ref[c:c + 1, :]
        d = d + diff * diff
    d_ref[...] = d

    newpts = newpts_ref[...].astype(jnp.float32)             # (gb, C)
    big = jnp.float32(3.0e38)
    n_chunks = S // chunk
    for kc in range(n_chunks):
        # --- selection of `chunk` nearest neighbors (smallest-index ties) ---
        for kk in range(chunk):
            iota_n = lax.broadcasted_iota(jnp.int32, (gb, N), 1)
            dcur = d_ref[...]
            minv = jnp.min(dcur, axis=1, keepdims=True)
            sel = jnp.min(jnp.where(dcur == minv, iota_n, N),
                          axis=1, keepdims=True)
            onehot = iota_n == sel
            d_ref[...] = jnp.where(onehot, big, dcur)        # exclude selected point
            oh_ref[kk] = onehot.astype(oh_ref.dtype)
        # --- gather: one (chunk*gb, N) @ (N, C) MXU matmul per chunk ---
        oh2 = oh_ref[...].reshape(chunk * gb, N)
        gath = lax.dot_general(oh2, x_ref[...], (((1,), (0,)), ((), ())),
                               preferred_element_type=jnp.float32)
        gath = gath.reshape(chunk, gb, C)
        for kk in range(chunk):
            col = (kc * chunk + kk) * C
            out_ref[:, col:col + C] = (gath[kk] - newpts).astype(out_ref.dtype)

    if out_ref.shape[1] > S * C:                              # zero the lane padding
        out_ref[:, S * C:] = jnp.zeros(
            (gb, out_ref.shape[1] - S * C), out_ref.dtype)


def knn_group_relative(xyz_t, x, center, new_points, group_size):
    """Returns (B, G, S*C): (x[knn idx] - x[center]), row-major over (k, c).
    Groups come out in whatever order `center`/`new_points` were supplied
    (already Morton-sorted by the caller)."""
    B, _, N = xyz_t.shape
    C = x.shape[2]
    G = center.shape[1]
    S = group_size
    g_blk = next((d for d in (128, 64, 32, 16, 8) if G % d == 0), G)
    chunk = next((d for d in (8, 4, 2) if S % d == 0), 1)
    SC = S * C
    SCp = ((SC + 127) // 128) * 128               # lane-dense output last dim
    itemsize = jnp.dtype(x.dtype).itemsize
    footprint = (2 * (3 * N * 4 + N * C * itemsize + g_blk * 3 * 4
                      + g_blk * C * itemsize)
                 + 2 * g_blk * SCp * itemsize
                 + g_blk * N * 4 + chunk * g_blk * N * itemsize)
    vmem_limit = int(min(64 * 2 ** 20, max(32 * 2 ** 20, 2 * footprint)))
    flops = int(B * (9 * G * N + 6 * S * G * N + 2 * G * S * N * C))
    bytes_acc = int(B * (12 * N + N * C * itemsize + 12 * G + G * C * itemsize
                         + G * SCp * itemsize))
    out = pl.pallas_call(
        functools.partial(_knn_group_kernel, group_size=S, chunk=chunk),
        out_shape=jax.ShapeDtypeStruct((B, G, SCp), x.dtype),
        grid=(B, G // g_blk),
        in_specs=[
            pl.BlockSpec((None, 3, N), lambda b, g: (b, 0, 0)),
            pl.BlockSpec((None, N, C), lambda b, g: (b, 0, 0)),
            pl.BlockSpec((None, g_blk, 3), lambda b, g: (b, g, 0)),
            pl.BlockSpec((None, g_blk, C), lambda b, g: (b, g, 0)),
        ],
        out_specs=pl.BlockSpec((None, g_blk, SCp), lambda b, g: (b, g, 0)),
        scratch_shapes=[pltpu.VMEM((g_blk, N), jnp.float32),
                        pltpu.VMEM((chunk, g_blk, N), x.dtype)],
        compiler_params=pltpu.CompilerParams(
            dimension_semantics=("parallel", "parallel"),
            vmem_limit_bytes=vmem_limit),
        cost_estimate=pl.CostEstimate(flops=flops, transcendentals=0,
                                      bytes_accessed=bytes_acc),
    )(xyz_t, x, center, new_points)
    return out[..., :SC]


# ----------------------------------------------------------------------------
# Morton encoding / argsort (plain JAX glue — bit interleave + argsort)
# ----------------------------------------------------------------------------
# TODO(synk): MortonEncoder source not provided; assuming points_to_morton returns
# the per-batch argsort of 10-bit-per-axis 3D Morton (Z-order) codes of the centers.
def _part1by2(v):
    v = v.astype(jnp.uint32) & jnp.uint32(0x3FF)
    v = (v | (v << 16)) & jnp.uint32(0x030000FF)
    v = (v | (v << 8)) & jnp.uint32(0x0300F00F)
    v = (v | (v << 4)) & jnp.uint32(0x030C30C3)
    v = (v | (v << 2)) & jnp.uint32(0x09249249)
    return v


def morton_argsort(center, bits=10):
    mins = jnp.min(center, axis=1, keepdims=True)
    maxs = jnp.max(center, axis=1, keepdims=True)
    scale = jnp.maximum(maxs - mins, 1e-12)
    q = jnp.clip((center - mins) / scale * (2 ** bits - 1), 0, 2 ** bits - 1)
    q = q.astype(jnp.uint32)
    code = (_part1by2(q[..., 0])
            | (_part1by2(q[..., 1]) << 1)
            | (_part1by2(q[..., 2]) << 2))
    return jnp.argsort(code, axis=1).astype(jnp.int32)


# ----------------------------------------------------------------------------
# Group.forward
# ----------------------------------------------------------------------------
def group_forward(x, xyz, num_group, group_size):
    B, N, C = x.shape
    G, S = num_group, group_size
    batch = jnp.arange(B)[:, None]

    xyz_t = jnp.swapaxes(xyz, 1, 2).astype(jnp.float32)        # (B, 3, N)
    fps_idx, center = furthest_point_sample(xyz_t, G)          # (B, G), (B, G, 3)

    # Morton ordering applied to the *small* per-group tensors before the KNN
    # kernel, so the large neighborhood tensor is produced already sorted and
    # the final full-tensor HBM gather is eliminated.
    sort_idx = morton_argsort(center)                          # (B, G)
    center = jnp.take_along_axis(center, sort_idx[..., None], axis=1)
    fps_sorted = jnp.take_along_axis(fps_idx, sort_idx, axis=1)
    new_points = x[batch, fps_sorted]                          # (B, G, C) tiny gather

    rel = knn_group_relative(xyz_t, x, center, new_points, S)  # (B, G, S*C)
    rel = rel.reshape(B, G, S, C)
    # Second half of the concat is a pure broadcast of the center feature ->
    # free in XLA; no kernel needed.
    neighborhood = jnp.concatenate(
        [rel, jnp.broadcast_to(new_points[:, :, None, :], (B, G, S, C))], axis=-1)

    # NOTE: the cdist(center, center) + eye-masking in _morton_sorting is dead
    # code in the reference (its result is never used), so it is omitted.
    return neighborhood, center


# ----------------------------------------------------------------------------
# Pure-JAX reference (same tie-break conventions) for a correctness check.
# ----------------------------------------------------------------------------
def _reference_group(x, xyz, num_group, group_size):
    B, N, C = x.shape
    batch = jnp.arange(B)[:, None]

    def fps_one(pts):
        def body(i, carry):
            sel, dist, far = carry
            sel = sel.at[i].set(far)
            d = jnp.sum((pts - pts[far]) ** 2, axis=-1)
            dist = jnp.minimum(dist, d)
            far = jnp.argmax(dist).astype(jnp.int32)
            return sel, dist, far
        init = (jnp.zeros((num_group,), jnp.int32),
                jnp.full((N,), 1e10, jnp.float32), jnp.int32(0))
        sel, _, _ = lax.fori_loop(0, num_group, body, init)
        return sel

    fps_idx = jax.vmap(fps_one)(xyz)
    center = xyz[batch, fps_idx]
    new_points = x[batch, fps_idx]
    d = jnp.sum((center[:, :, None, :] - xyz[:, None, :, :]) ** 2, axis=-1)
    idx = jnp.argsort(d, axis=-1)[..., :group_size]
    grouped = x[jnp.arange(B)[:, None, None], idx]
    neighborhood = jnp.concatenate(
        [grouped - new_points[:, :, None, :],
         jnp.broadcast_to(new_points[:, :, None, :],
                          (B, num_group, group_size, C))],
        axis=-1)
    sort_idx = morton_argsort(center)
    return neighborhood[batch, sort_idx], center[batch, sort_idx]


if __name__ == "__main__":
    key = jax.random.PRNGKey(0)
    k1, k2 = jax.random.split(key)
    B, N, C = 2, 64, 4
    num_group, group_size = 8, 8

    xyz = jax.random.normal(k1, (B, N, 3), jnp.float32)
    x = jax.random.normal(k2, (B, N, C), jnp.float32)

    neighborhood, center = group_forward(x, xyz, num_group, group_size)
    jax.block_until_ready((neighborhood, center))

    assert neighborhood.shape == (B, num_group, group_size, 2 * C)
    assert neighborhood.dtype == jnp.float32
    assert center.shape == (B, num_group, 3)

    ref_nb, ref_ct = _reference_group(x, xyz, num_group, group_size)
    assert jnp.allclose(neighborhood, ref_nb, atol=1e-5, rtol=1e-5)
    assert jnp.allclose(center, ref_ct, atol=1e-5, rtol=1e-5)

    print("KERNEL_OK")
</pallas_src>

<mosaic_0001>
module attributes {stable_mosaic.version = 11 : i64} {
  func.func @_fps_kernel(%arg0: i32, %arg1: memref<1x3x8x8xf32, #tpu.memory_space<vmem>>, %arg2: memref<1x8x1xi32, #tpu.memory_space<vmem>>, %arg3: memref<1x8x3xf32, #tpu.memory_space<vmem>>) attributes {dimension_semantics = [#tpu.dimension_semantics<parallel>], iteration_bounds = array<i64: 2>, scalar_prefetch = 0 : i64, scratch_operands = 0 : i64, tpu.core_type = #tpu.core_type<tc>, window_params = [{transform_indices = @transform_0, window_bounds = array<i64: 1, 3, 8, 8>}, {transform_indices = @transform_1, window_bounds = array<i64: 1, 8, 1>}, {transform_indices = @transform_2, window_bounds = array<i64: 1, 8, 3>}]} {
    %0 = tpu.iota {dimensions = array<i32: 0>} : vector<8x8xi32>
    %c8_i32 = arith.constant 8 : i32
    %1 = vector.broadcast %c8_i32 : i32 to vector<8x8xi32>
    %2 = arith.muli %0, %1 : vector<8x8xi32>
    %3 = tpu.iota {dimensions = array<i32: 1>} : vector<8x8xi32>
    %4 = arith.addi %2, %3 : vector<8x8xi32>
    %c64_i32 = arith.constant 64 : i32
    %5 = vector.broadcast %c64_i32 : i32 to vector<8x8xi32>
    %6 = arith.cmpi slt, %4, %5 : vector<8x8xi32>
    %cst = arith.constant 1.000000e+10 : f32
    %cst_0 = arith.constant -1.000000e+00 : f32
    %7 = vector.broadcast %cst : f32 to vector<8x8xf32>
    %8 = vector.broadcast %cst_0 : f32 to vector<8x8xf32>
    %9 = arith.select %6, %7, %8 : vector<8x8xi1>, vector<8x8xf32>
    %c0_i32 = arith.constant 0 : i32
    %10 = vector.broadcast %c0_i32 : i32 to vector<1x1xi32>
    %c0_i32_1 = arith.constant 0 : i32
    %c8_i32_2 = arith.constant 8 : i32
    %11 = arith.addi %c0_i32_1, %c8_i32_2 : i32
    %c1_i32 = arith.constant 1 : i32
    %12:2 = scf.for %arg4 = %c0_i32_1 to %11 step %c1_i32 iter_args(%arg5 = %9, %arg6 = %10) -> (vector<8x8xf32>, vector<1x1xi32>)  : i32 {
      %c0 = arith.constant 0 : index
      %13 = arith.index_cast %arg4 : i32 to index
      %c0_4 = arith.constant 0 : index
      %14 = vector.load %arg2[%c0, %13, %c0_4] : memref<1x8x1xi32, #tpu.memory_space<vmem>>, vector<1x1x1xi32>
      %15 = vector.shape_cast %14 : vector<1x1x1xi32> to vector<1x1xi32>
      %16 = vector.shape_cast %arg6 : vector<1x1xi32> to vector<1x1x1xi32>
      tpu.vector_store %arg2[%c0, %13, %c0_4], %16 {strides = array<i32>} : memref<1x8x1xi32, #tpu.memory_space<vmem>>, vector<1x1x1xi32>,
      %17 = vector.broadcast %arg6 : vector<1x1xi32> to vector<8x8xi32>
      %18 = arith.cmpi eq, %4, %17 : vector<8x8xi32>
      %cst_5 = arith.constant 0.000000e+00 : f32
      %19 = vector.broadcast %cst_5 : f32 to vector<8x8xf32>
      %c0_6 = arith.constant 0 : index
      %c0_7 = arith.constant 0 : index
      %c0_8 = arith.constant 0 : index
      %c0_9 = arith.constant 0 : index
      %20 = vector.load %arg1[%c0_6, %c0_7, %c0_8, %c0_9] : memref<1x3x8x8xf32, #tpu.memory_space<vmem>>, vector<1x1x8x8xf32>
      %21 = vector.shape_cast %20 : vector<1x1x8x8xf32> to vector<8x8xf32>
      %cst_10 = arith.constant 0.000000e+00 : f32
      %22 = vector.broadcast %cst_10 : f32 to vector<8x8xf32>
      %23 = arith.select %18, %21, %22 : vector<8x8xi1>, vector<8x8xf32>
      %cst_11 = arith.constant dense<0.000000e+00> : vector<8xf32>
      %24 = vector.multi_reduction <add>, %23, %cst_11 [1] : vector<8x8xf32> to vector<8xf32>
      %25 = vector.shape_cast %24 : vector<8xf32> to vector<8x1xf32>
      %cst_12 = arith.constant dense<0.000000e+00> : vector<1xf32>
      %26 = vector.multi_reduction <add>, %25, %cst_12 [0] : vector<8x1xf32> to vector<1xf32>
      %27 = vector.shape_cast %26 : vector<1xf32> to vector<1x1xf32>
      %28 = vector.broadcast %27 : vector<1x1xf32> to vector<8x8xf32>
      %29 = arith.subf %21, %28 : vector<8x8xf32>
      %30 = arith.mulf %29, %29 : vector<8x8xf32>
      %31 = arith.addf %19, %30 : vector<8x8xf32>
      %c0_13 = arith.constant 0 : index
      %c1 = arith.constant 1 : index
      %c0_14 = arith.constant 0 : index
      %c0_15 = arith.constant 0 : index
      %32 = vector.load %arg1[%c0_13, %c1, %c0_14, %c0_15] : memref<1x3x8x8xf32, #tpu.memory_space<vmem>>, vector<1x1x8x8xf32>
      %33 = vector.shape_cast %32 : vector<1x1x8x8xf32> to vector<8x8xf32>
      %cst_16 = arith.constant 0.000000e+00 : f32
      %34 = vector.broadcast %cst_16 : f32 to vector<8x8xf32>
      %35 = arith.select %18, %33, %34 : vector<8x8xi1>, vector<8x8xf32>
      %cst_17 = arith.constant dense<0.000000e+00> : vector<8xf32>
      %36 = vector.multi_reduction <add>, %35, %cst_17 [1] : vector<8x8xf32> to vector<8xf32>
      %37 = vector.shape_cast %36 : vector<8xf32> to vector<8x1xf32>
      %cst_18 = arith.constant dense<0.000000e+00> : vector<1xf32>
      %38 = vector.multi_reduction <add>, %37, %cst_18 [0] : vector<8x1xf32> to vector<1xf32>
      %39 = vector.shape_cast %38 : vector<1xf32> to vector<1x1xf32>
      %40 = vector.broadcast %39 : vector<1x1xf32> to vector<8x8xf32>
      %41 = arith.subf %33, %40 : vector<8x8xf32>
      %42 = arith.mulf %41, %41 : vector<8x8xf32>
      %43 = arith.addf %31, %42 : vector<8x8xf32>
      %c0_19 = arith.constant 0 : index
      %c2 = arith.constant 2 : index
      %c0_20 = arith.constant 0 : index
      %c0_21 = arith.constant 0 : index
      %44 = vector.load %arg1[%c0_19, %c2, %c0_20, %c0_21] : memref<1x3x8x8xf32, #tpu.memory_space<vmem>>, vector<1x1x8x8xf32>
      %45 = vector.shape_cast %44 : vector<1x1x8x8xf32> to vector<8x8xf32>
      %cst_22 = arith.constant 0.000000e+00 : f32
      %46 = vector.broadcast %cst_22 : f32 to vector<8x8xf32>
      %47 = arith.select %18, %45, %46 : vector<8x8xi1>, vector<8x8xf32>
      %cst_23 = arith.constant dense<0.000000e+00> : vector<8xf32>
      %48 = vector.multi_reduction <add>, %47, %cst_23 [1] : vector<8x8xf32> to vector<8xf32>
      %49 = vector.shape_cast %48 : vector<8xf32> to vector<8x1xf32>
      %cst_24 = arith.constant dense<0.000000e+00> : vector<1xf32>
      %50 = vector.multi_reduction <add>, %49, %cst_24 [0] : vector<8x1xf32> to vector<1xf32>
      %51 = vector.shape_cast %50 : vector<1xf32> to vector<1x1xf32>
      %52 = vector.broadcast %51 : vector<1x1xf32> to vector<8x8xf32>
      %53 = arith.subf %45, %52 : vector<8x8xf32>
      %54 = arith.mulf %53, %53 : vector<8x8xf32>
      %55 = arith.addf %43, %54 : vector<8x8xf32>
      %56 = tpu.concatenate %27, %39, %51 in 1 : vector<1x1xf32>, vector<1x1xf32>, vector<1x1xf32> -> vector<1x3xf32>
      %c0_25 = arith.constant 0 : index
      %57 = arith.index_cast %arg4 : i32 to index
      %c0_26 = arith.constant 0 : index
      %58 = vector.load %arg3[%c0_25, %57, %c0_26] : memref<1x8x3xf32, #tpu.memory_space<vmem>>, vector<1x1x3xf32>
      %59 = vector.shape_cast %58 : vector<1x1x3xf32> to vector<1x3xf32>
      %60 = vector.shape_cast %56 : vector<1x3xf32> to vector<1x1x3xf32>
      tpu.vector_store %arg3[%c0_25, %57, %c0_26], %60 {strides = array<i32>} : memref<1x8x3xf32, #tpu.memory_space<vmem>>, vector<1x1x3xf32>,
      %61 = arith.minimumf %arg5, %55 : vector<8x8xf32>
      %cst_27 = arith.constant dense<0xFF800000> : vector<8xf32>
      %62 = vector.multi_reduction <maximumf>, %61, %cst_27 [1] : vector<8x8xf32> to vector<8xf32>
      %63 = vector.shape_cast %62 : vector<8xf32> to vector<8x1xf32>
      %cst_28 = arith.constant dense<0xFF800000> : vector<1xf32>
      %64 = vector.multi_reduction <maximumf>, %63, %cst_28 [0] : vector<8x1xf32> to vector<1xf32>
      %65 = vector.shape_cast %64 : vector<1xf32> to vector<1x1xf32>
      %66 = vector.broadcast %65 : vector<1x1xf32> to vector<8x8xf32>
      %67 = arith.cmpf oeq, %61, %66 : vector<8x8xf32>
      %c64_i32_29 = arith.constant 64 : i32
      %68 = vector.broadcast %c64_i32_29 : i32 to vector<8x8xi32>
      %69 = arith.select %67, %4, %68 : vector<8x8xi1>, vector<8x8xi32>
      %cst_30 = arith.constant dense<2147483647> : vector<8xi32>
      %70 = vector.multi_reduction <minsi>, %69, %cst_30 [1] : vector<8x8xi32> to vector<8xi32>
      %71 = vector.shape_cast %70 : vector<8xi32> to vector<8x1xi32>
      %cst_31 = arith.constant dense<2147483647> : vector<1xi32>
      %72 = vector.multi_reduction <minsi>, %71, %cst_31 [0] : vector<8x1xi32> to vector<1xi32>
      %73 = vector.shape_cast %72 : vector<1xi32> to vector<1x1xi32>
      scf.yield %61, %73 : vector<8x8xf32>, vector<1x1xi32>
    }
    %c8_i32_3 = arith.constant 8 : i32
    return
  }
  func.func @transform_0(%arg0: i32) -> (i32, i32, i32, i32) {
    %c0_i32 = arith.constant 0 : i32
    %c0_i32_0 = arith.constant 0 : i32
    %c0_i32_1 = arith.constant 0 : i32
    %c0_i32_2 = arith.constant 0 : i32
    return %arg0, %c0_i32, %c0_i32_0, %c0_i32_1 : i32, i32, i32, i32
  }
  func.func @transform_1(%arg0: i32) -> (i32, i32, i32) {
    %c0_i32 = arith.constant 0 : i32
    %c0_i32_0 = arith.constant 0 : i32
    %c0_i32_1 = arith.constant 0 : i32
    return %arg0, %c0_i32, %c0_i32_0 : i32, i32, i32
  }
  func.func @transform_2(%arg0: i32) -> (i32, i32, i32) {
    %c0_i32 = arith.constant 0 : i32
    %c0_i32_0 = arith.constant 0 : i32
    %c0_i32_1 = arith.constant 0 : i32
    return %arg0, %c0_i32, %c0_i32_0 : i32, i32, i32
  }
}

</mosaic_0001>

<bundles_post_ra>
// kernel: tpu_custom_call.1
= control target key start
LH: loop header
LB: loop body
LE: loop exit
PB: predicated region body
PF: predicated region fallthrough
CT: control target
= control target key end

     0   :  { %8 = vsyncpa [#allocation3], 0  ;;  %s731_s0 = inlined_call_operand.hbm [shape: f32[2,3,8,8], index: 0, kind: input, shape index: {}]   ;;  %s732_s1 = inlined_call_operand.vmem [shape: s32[2,8,1], index: 1, kind: output, shape index: {0}]   ;;  %s733_s2 = inlined_call_operand.vmem [shape: f32[2,8,3], index: 2, kind: output, shape index: {1}]  }
   0x1   :  { %10 = vsyncpa [#allocation3 + $0x1], 0  ;;  %s579_s9 = smov 0   ;;  %s581_s10 = smov 0  }
   0x2   :  { %s583_s11 = smov 0   ;;  %s585_s12 = smov 0  }
   0x3 LB: > { %s598_s13 = sadd.s32 4294967295, %s546_s12   ;;  %s601_s14 = sadd.s32 1, %s546_s12   ;;  %s546_s12 = sphi %s585_s12, %s740_s12   ;;  %s542_s11 = sphi %s583_s11, %s739_s11   ;;  %s538_s10 = sphi %s581_s10, %s738_s10   ;;  %s534_s9 = sphi %s579_s9, %s737_s9  }
   0x4   : > { %s20_s15 = ssub.s32 %s546_s12, %s601_s14  ;;  %s23_s16 = sadd.s32 1, %s542_s11 }
   0x5   : > { %p21_p0 = scmp.eq.s32.totalorder %s20_s15, 0  ;;  %p30_p1 = scmp.ne.s32.totalorder %s542_s11, %s538_s10 }
   0x6   : > { %p31_p2 = scmp.eq.s32.totalorder %s546_s12, 0  ;;  %p36_p3 = scmp.ne.s32.totalorder %s538_s10, %s534_s9 }
   0x7   : > { %s611_s17 = scalar_select %p21_p0, %s542_s11, %s23_s16  }
   0x8   : > { %p32_p4 = por %p31_p2, %p30_p1  ;;  %p37_p5 = scmp.eq.s32.totalorder %s598_s13, 0 }
   0x9   : > { %p410_p6 = scmp.lt.s32.totalorder %s546_s12, 2  ;;  %s112_s19 = sand.u32 1, %s542_s11  }
   0xa   : > { %p615_p7 = por %p37_p5, %p36_p3  ;;  %s401_s20 = smul.u32 24, %s112_s19 }
   0xb   : > { %s402_s21 = smul.u32 384, %s546_s12  ;;  %p621_p8 = pnand %p410_p6, %p32_p4 }
   0xc   : > { %s116_s26 = scalar_lea.vmem [#allocation2], %s401_s20  ;;  %s633_s28 = scalar_lea.sflag [#allocation3], %s112_s19 }
   0xd   : > { %s628_s25 = scalar_lea.hbm %s731_s0, %s402_s21  ;;  %s123_s27 = sshll.u32 %s116_s26, 4  ;;  %s630_s27 = int_to_ptr.vmem [resolvable:$true] %s123_s27 }
   0xe   : > { %s470_s29 = scalar_lea.hbm %s628_s25, 384  ;;  %p472_p11 = pneg %p621_p8 }
   0xf   : > { %p471_p10 = scmp.ne.s32.totalorder %s628_s25, %s470_s29  ;;  %s475_s4 = scalar_lea.hbm %s731_s0, 768 }
  0x10   : > { %p476_p0 = scmp.lt.u32.totalorder %s628_s25, %s731_s0  ;;  %p477_p1 = scmp.lt.u32.totalorder %s475_s4, %s470_s29 }
  0x11   : > { %p473_p12 = pnand %p472_p11, %p471_p10  ;;  %p479_p3 = scmp.lt.u32.totalorder %s470_s29, %s628_s25 }
  0x12   : > { %p478_p2 = por %p477_p1, %p476_p0 }
  0x13   : > { %p474_p13 = pneg %p473_p12 }
  0x14   : > { %p480_p4 = por %p479_p3, %p478_p2 }
  0x16   : > { %p481_p5 = pnand %p480_p4, %p474_p13 }
  0x18   : > { %484 = shalt.err (!%p481_p5)
}
  0x19   : > { %s485_s7 = scalar_lea.vmem %s630_s27, 384  ;;  %s560_s8 = smov [#allocation2]  }
  0x1a   : > { %p486_p6 = scmp.ne.s32.totalorder %s630_s27, %s485_s7  ;;  %s490_s9 = sshll.u32 %s560_s8, 4  ;;  %s491_s9 = int_to_ptr.vmem [resolvable:$false] %s490_s9 }
  0x1b   : > { %s492_s15 = scalar_lea.vmem %s491_s9, 768  ;;  %p493_p9 = scmp.lt.s32.totalorder %s630_s27, %s491_s9 }
  0x1c   : > { %p488_p10 = pnand %p486_p6, %p472_p11  ;;  %p494_p0 = scmp.lt.s32.totalorder %s492_s15, %s485_s7 }
  0x1e   : > { %p489_p12 = pneg %p488_p10  ;;  %p495_p1 = por %p494_p0, %p493_p9 }
  0x20   : > { %p496_p2 = pnand %p495_p1, %p489_p12 }
  0x22   : > { %499 = shalt.err (!%p496_p2)
}
  0x23   : > { %s561_s16 = smov 128   ;;  %s562_s19 = smov 8  }
  0x24   : > { %409 = dma.hbm_to_vmem [thread:$0]  (!%p621_p8), %s628_s25, 384, %s630_s27, %s633_s28, %s561_s16, %s561_s16, %s562_s19  }
  0x25   : > { %p131_p11 = scmp.lt.s32.totalorder %s546_s12, 3  ;;  %p736_p13 = scmp.ge.s32.totalorder %s546_s12, 1 }
  0x27   : > { %p132_p3 = pnand %p736_p13, %p131_p11 }
  0x28   : > { %s137_s20 = sand.u32 (!%p132_p3), 1, %s538_s10  }
  0x29   : > { %135 = sbr.rel (%p132_p3) target bundleno = 694 (0x2b6), region = 24  ;;  %s138_s23 = scalar_lea.sflag (!%p132_p3), [#allocation3], %s137_s20 }
  0x2a   : > { %s403_s21 = smul.u32 (!%p132_p3), 24, %s137_s20 }
  0x2c   : > { %s665_s24 = scalar_lea.vmem (!%p132_p3), [#allocation2], %s403_s21 }
  0x30   : > { %529 = dma.done.wait (%p615_p7), %s138_s23, 384  }
  0x31   : > { %531 = vsyncadd (%p615_p7), %s138_s23, 4294966912  ;;  %p165_p9 = scmp.lt.s32.totalorder %s598_s13, 1  ;;  %v173_v0 = vlaneseq  ;;  %v563_v5 = vmov -1.0   ;;  %v686_v7 = vmov 0  }
  0x33   : > { %s742_s13 = smov (!%p165_p9, %s598_s13), 1  ;;  %v174_v1 = vshrl.u32 %v173_v0, 7  ;;  %v177_v2 = vand.u32 127, %v173_v0 }
  0x34   : > { %s395_s12 = sshll.u32 %s742_s13, 3  ;;  %s690_s13 = smov 0  }
  0x35   : > { %v175_v3 = vmul.u32 8, %v174_v1  ;;  %s676_s26 = scalar_lea.vmem %s732_s1, %s395_s12  ;;  %s681_s29 = scalar_lea.vmem %s733_s2, %s395_s12 }
  0x37   : > { %v683_v4 = vadd.s32 %v177_v2, %v175_v3 }
  0x39   : > { %vm179_vm0 = vcmp.lt.s32.totalorder %v683_v4, 64 }
  0x3a   : > { %v180_v6 = vsel %vm179_vm0, 1e+10, %v563_v5  }
  0x3b LB: >> { %vm190_vm1 = vcmask 0   ;;  %v398_v8 = vld [vmem:[%s665_s24 + $0x10] sm:$0xff]  ;;  %v193_v9 = vld [vmem:[%s665_s24] sm:$0xff]  ;;  %v397_v10 = vld [vmem:[%s665_s24 + $0x8] sm:$0xff]  ;;  %vm195_vm2 = vcmask 64512   ;;  %s189_s18 = scalar_lea.vmem %s676_s26, %s558_s13  ;;  %vm192_vm3 = vcmp.eq.s32.totalorder %v683_v4, %v550_v7  ;;  %vm238_vm4 = vcmask 7168   ;;  %s242_s30 = scalar_lea.vmem %s681_s29, %s558_s13  ;;  %s558_s13 = sphi %s690_s13, %s186_s13   ;;  %v554_v6 = vphi %v180_v6, %v245_v6   ;;  %v550_v7 = vphi %v686_v7, %v280_v7  }
  0x3c   : >> { %v225_v11 = vsel %vm192_vm3, %v398_v8, 0.0  ;;  %191 = vst.msk [vmem:[%s189_s18] sm:$0x1] %vm190_vm1, %v550_v7  ;;  %v194_v12 = vsel %vm192_vm3, %v193_v9, 0.0  ;;  %v210_v13 = vsel %vm192_vm3, %v397_v10, 0.0  ;;  %vm240_vm5 = vcmask 15360  }
  0x3d   : >> { %v226_v14 = vsel %vm195_vm2, %v225_v11, 0.0  ;;  %v196_v15 = vsel %vm195_vm2, %v194_v12, 0.0  ;;  %v211_v16 = vsel %vm195_vm2, %v210_v13, 0.0  ;;  %vm243_vm6 = vcmask 16384   ;;  %s186_s13 = sadd.s32 1, %s558_s13  }
  0x3e   : >> { %227 = vadd.xlane.f32.xlu1 %v226_v14  ;;  %197 = vadd.xlane.f32.xlu0 %v196_v15  ;;  %p183_p7 = scmp.ge.s32.totalorder %s186_s13, 8  }
  0x42   : >> { %212 = vadd.xlane.f32.xlu0 %v211_v16 }
  0xcb   : >> { %v228_v17 = vpop.xlane.xlu1 %227  ;;  %v198_v18 = vpop.xlane.xlu0 %197 }
  0xcc   : >> { %v229_v19 = vrot.slane %v228_v17, 4  ;;  %v199_v20 = vrot.slane %v198_v18, 4 }
  0xce   : >> { %v230_v21 = vadd.f32 %v229_v19, %v228_v17  ;;  %v200_v22 = vadd.f32 %v199_v20, %v198_v18 }
  0xcf   : >> { %v213_v23 = vpop.xlane.xlu0 %212 }
  0xd0   : >> { %v231_v24 = vrot.slane %v230_v21, 2  ;;  %v201_v25 = vrot.slane %v200_v22, 2  ;;  %v214_v26 = vrot.slane %v213_v23, 4 }
  0xd2   : >> { %v232_v27 = vadd.f32 %v231_v24, %v230_v21  ;;  %v202_v28 = vadd.f32 %v201_v25, %v200_v22  ;;  %v215_v29 = vadd.f32 %v214_v26, %v213_v23 }
  0xd4   : >> { %v233_v30 = vrot.slane %v232_v27, 1  ;;  %v203_v31 = vrot.slane %v202_v28, 1  ;;  %v216_v32 = vrot.slane %v215_v29, 2 }
  0xd6   : >> { %v204_v33 = vadd.f32 %v203_v31, %v202_v28  ;;  %v217_v34 = vadd.f32 %v216_v32, %v215_v29  ;;  %v234_v35 = vadd.f32 %v233_v30, %v232_v27 }
  0xd8   : >> { %v218_v36 = vrot.slane %v217_v34, 1  ;;  %v205_v37 = vsub.f32 %v193_v9, %v204_v33  ;;  %v235_v41 = vsub.f32 %v398_v8, %v234_v35 }
  0xda   : >> { %v219_v38 = vadd.f32 %v218_v36, %v217_v34  ;;  %v206_v43 = vmul.f32 %v205_v37, %v205_v37  ;;  %v236_v46 = vmul.f32 %v235_v41, %v235_v41 }
  0xdc   : >> { %v220_v39 = vsub.f32 %v397_v10, %v219_v38  ;;  %v239_v40 = vsel %vm238_vm4, %v204_v33, %v219_v38 }
  0xdd   : >> { %v241_v42 = vsel %vm240_vm5, %v239_v40, %v234_v35 }
  0xde   : >> { %v221_v44 = vmul.f32 %v220_v39, %v220_v39  ;;  %244 = vst.msk [vmem:[%s242_s30] sm:$0x1] %vm243_vm6, %v241_v42 }
  0xe0   : >> { %v222_v45 = vadd.f32 %v221_v44, %v206_v43 }
  0xe2   : >> { %v237_v47 = vadd.f32 %v236_v46, %v222_v45 }
  0xe4   : >> { %v245_v6 = vmin.f32 %v554_v6, %v237_v47  }
  0xe6   : >> { %v246_v48 = vsel %vm195_vm2, %v245_v6, -inf }
  0xe7   : >> { %247 = vmax.xlane.f32.xlu1 %v246_v48 }
 0x174   : >> { %v248_v49 = vpop.xlane.xlu1 %247 }
 0x175   : >> { %v249_v50 = vrot.slane %v248_v49, 4 }
 0x177   : >> { %v250_v51 = vmax.f32 %v248_v49, %v249_v50 }
 0x179   : >> { %v251_v52 = vrot.slane %v250_v51, 2 }
 0x17b   : >> { %v252_v53 = vmax.f32 %v250_v51, %v251_v52 }
 0x17d   : >> { %v253_v54 = vrot.slane %v252_v53, 1 }
 0x17f   : >> { %v254_v55 = vmax.f32 %v252_v53, %v253_v54 }
 0x181   : >> { %vm255_vm7 = vcmp.eq.f32.partialorder %v245_v6, %v254_v55 }
 0x182   : >> { %v256_v56 = vsel %vm255_vm7, %v683_v4, 64 }
 0x183   : >> { %v257_v57 = vsel %vm195_vm2, %v256_v56, 2147483647 }
 0x184   : >> { %v259_v58 = vshra.s32 %v257_v57, 16  ;;  %v258_v60 = vand.u32 65535, %v257_v57 }
 0x186   : >> { %v261_v59 = vcvt.s32.f32 %v259_v58  ;;  %v260_v62 = vcvt.s32.f32 %v258_v60 }
 0x188   : >> { %262 = vmin.xlane.f32.xlu0 %v261_v59 }
 0x215   : >> { %v263_v61 = vpop.xlane.xlu0 %262 }
 0x216   : >> { %vm264_vm8 = vcmp.eq.f32.partialorder %v261_v59, %v263_v61  ;;  %v269_v0 = vcvt.f32.s32 %v263_v61 }
 0x217   : >> { %v265_v63 = vsel %vm264_vm8, %v260_v62, inf }
 0x218   : >> { %266 = vmin.xlane.f32.xlu1 %v265_v63  ;;  %v270_v2 = vshll.u32 %v269_v0, 16 }
 0x2a5   : >> { %v267_v1 = vpop.xlane.xlu1 %266 }
 0x2a6   : >> { %v268_v3 = vcvt.f32.s32 %v267_v1 }
 0x2a8   : >> { %v271_v5 = vadd.s32 %v270_v2, %v268_v3 }
 0x2aa   : >> { %v272_v7 = vrot.slane %v271_v5, 4 }
 0x2ac   : >> { %vm273_vm9 = vcmp.lt.s32.totalorder %v271_v5, %v272_v7 }
 0x2ad   : >> { %v274_v8 = vsel %vm273_vm9, %v271_v5, %v272_v7 }
 0x2ae   : >> { %v275_v9 = vrot.slane %v274_v8, 2 }
 0x2af   : > { %185 = sbr.rel (!%p183_p7) target bundleno = 59 (0x3b), region = 87 }
 0x2b0   : >> { %vm276_vm10 = vcmp.lt.s32.totalorder %v274_v8, %v275_v9 }
 0x2b1   : >> { %v277_v10 = vsel %vm276_vm10, %v274_v8, %v275_v9 }
 0x2b2   : >> { %v278_v11 = vrot.slane %v277_v10, 1 }
 0x2b4   : >> { %vm279_vm11 = vcmp.lt.s32.totalorder %v277_v10, %v278_v11 }
 0x2b5   : >> { %v280_v7 = vsel %vm279_vm11, %v277_v10, %v278_v11  }
 0x2b6 PF: > { %p13_p8 = scmp.ge.s32.totalorder %s601_s14, 4   ;;  %s737_s9 = smov %s538_s10 }
 0x2b7   : > { %s738_s10 = smov %s542_s11  ;;  %s739_s11 = smov %s611_s17 }
 0x2b8   : > { %s740_s12 = smov %s601_s14  ;;  %15 = sbr.rel (!%p13_p8) target bundleno = 3 (0x3), region = 98 }
 0x2bf   :  { %314 = vsyncpa [#allocation3], 1 }
 0x2c0   :  { %316 = vsyncpa [#allocation3 + $0x1], 1 }

</bundles_post_ra>
